<compile_context>
chip_gen: v6e
topology: v6e:2x2x1
jax: 0.10.0
libtpu: 0.0.40
codegen_flags: <defaults>
</compile_context>

<pallas_src>
import functools

import numpy as np
import jax
import jax.numpy as jnp
from jax.experimental import pallas as pl
from jax.experimental.pallas import tpu as pltpu


def _duc_kernel(x_ref, t_ref, bias_ref, out_ref):
    """Fused conv3x3 + BN + ReLU as one MXU matmul + tiny epilogue.

    x_ref:    (N*H, 3*W*Cin)   bf16  K-stacked input rows (dy=-1/0/+1 blocks)
    t_ref:    (3*W*Cin, W*Cout) bf16 banded conv weights, BN scale folded in,
                                     columns pre-permuted to pixel-shuffle order
    bias_ref: (1, W*Cout)      f32   folded conv bias + BN bias (same order)
    out_ref:  (N*H, W*Cout)    bf16  conv+bn+relu output (pre pixel-shuffle)
    """
    y = jnp.dot(x_ref[...], t_ref[...], preferred_element_type=jnp.float32)
    y = y + bias_ref[...]
    out_ref[...] = jnp.maximum(y, 0.0).astype(out_ref.dtype)


def make_duc_params(conv_w_oihw, conv_b, gamma, beta, running_mean, running_var,
                    *, width, down_factor, eps=1e-5):
    """One-time (host-side) parameter preparation.

    Returns:
      t:    (3*W*Cin, W*Cout) bf16 -- per-dy banded (Toeplitz) conv matrices
            stacked along K.  The 3 horizontal taps + left/right zero padding
            are baked into the band structure; BN scale is folded in; columns
            are permuted into pixel-shuffle-friendly (c, i, w, j) order.
      bias: (1, W*Cout) f32 -- folded conv bias + BN bias, same column order.
    """
    W = width
    r = down_factor
    Cout, Cin, _, _ = conv_w_oihw.shape
    C_cls = Cout // (r * r)

    w_hwio = jnp.transpose(conv_w_oihw, (2, 3, 1, 0)).astype(jnp.float32)  # (3,3,Cin,Cout)

    # Banded matrix per kernel row dy: rows indexed (w_in, cin), cols (w_out, cout).
    mats = []
    for dy in range(3):
        t_dy = jnp.zeros((W * Cin, W * Cout), jnp.float32)
        for dx in range(3):
            # shift[w_in, w_out] = 1  iff  w_in == w_out + dx - 1 (zero pad elsewhere)
            shift = jnp.eye(W, k=1 - dx, dtype=jnp.float32)
            t_dy = t_dy + jnp.kron(shift, w_hwio[dy, dx])
        mats.append(t_dy)
    t = jnp.concatenate(mats, axis=0)                          # (3*W*Cin, W*Cout)

    # Eval-mode BN fold:  bn(conv + b) = s*conv + (s*(b - mean) + beta)
    inv_std = 1.0 / jnp.sqrt(running_var.astype(jnp.float32) + eps)
    scale = gamma.astype(jnp.float32) * inv_std                # (Cout,)
    bias = scale * (conv_b.astype(jnp.float32)
                    - running_mean.astype(jnp.float32)) + beta.astype(jnp.float32)

    # Kernel output columns are ordered (w, cout): fold the per-channel scale
    # into the weight columns, keep the bias in f32.
    t = t * jnp.tile(scale, W)[None, :]
    bias_cols = jnp.tile(bias, W)

    # Pixel-shuffle column permutation: new column k = ((c*r + i)*W + w)*r + j
    # takes old column w*Cout + c*r*r + i*r + j, so the post-kernel transpose
    # only has to swap H and C (contiguous r*W*r blocks).
    c = np.arange(C_cls)[:, None, None, None]
    i = np.arange(r)[None, :, None, None]
    w = np.arange(W)[None, None, :, None]
    j = np.arange(r)[None, None, None, :]
    perm = (w * Cout + c * (r * r) + i * r + j).reshape(-1)    # new col -> old col

    t = t[:, perm].astype(jnp.bfloat16)
    bias_cols = bias_cols[perm].reshape(1, W * Cout).astype(jnp.float32)
    return t, bias_cols


def duc_forward(x_nchw, t, bias_cols, *, down_factor):
    """_DenseUpsamplingConvModule forward (eval-mode BN). NCHW in / NCHW out."""
    N, Cin, H, W = x_nchw.shape
    r = down_factor
    WCo = t.shape[1]
    Cout = WCo // W
    C_cls = Cout // (r * r)
    M = N * H
    K3 = 3 * W * Cin

    # NCHW -> bf16 NHWC rows (H, W*Cin), then K-stack the three vertical taps
    # (rows h-1 / h / h+1, zero at the image borders) on the lane axis so the
    # whole 3x3 conv becomes a single matmul with contraction depth 3*W*Cin.
    x_rows = jnp.transpose(x_nchw, (0, 2, 3, 1)).astype(jnp.bfloat16)
    x_rows = x_rows.reshape(N, H, W * Cin)
    x_pad = jnp.pad(x_rows, ((0, 0), (1, 1), (0, 0)))
    x_stacked = jnp.concatenate(
        [x_pad[:, 0:H], x_pad[:, 1:H + 1], x_pad[:, 2:H + 2]],
        axis=-1).reshape(M, K3)

    out_rows = pl.pallas_call(
        _duc_kernel,
        out_shape=jax.ShapeDtypeStruct((M, WCo), jnp.bfloat16),
        grid=(1,),
        in_specs=[
            pl.BlockSpec((M, K3), lambda i: (0, 0)),
            pl.BlockSpec((K3, WCo), lambda i: (0, 0)),
            pl.BlockSpec((1, WCo), lambda i: (0, 0)),
        ],
        out_specs=pl.BlockSpec((M, WCo), lambda i: (0, 0)),
        compiler_params=pltpu.CompilerParams(
            dimension_semantics=("arbitrary",)),
    )(x_stacked, t, bias_cols)

    # PixelShuffle: columns already come out in (c, i, w, j) order, so only a
    # cheap (N,H,C,r,W,r) -> (N,C,H,r,W,r) transpose of contiguous r*W*r blocks
    # remains, running in bf16.
    y = out_rows.reshape(N, H, C_cls, r, W, r)
    y = jnp.transpose(y, (0, 2, 1, 3, 4, 5))
    y = y.reshape(N, C_cls, H * r, W * r)
    return y.astype(jnp.float32)


def _reference(x_nchw, conv_w, conv_b, gamma, beta, mean, var, *, down_factor,
               eps=1e-5):
    """Pure-JAX f32 reference for a sanity check."""
    y = jax.lax.conv_general_dilated(
        x_nchw, conv_w, window_strides=(1, 1), padding=((1, 1), (1, 1)),
        dimension_numbers=("NCHW", "OIHW", "NCHW"))
    y = y + conv_b[None, :, None, None]
    y = (y - mean[None, :, None, None]) / jnp.sqrt(var + eps)[None, :, None, None]
    y = y * gamma[None, :, None, None] + beta[None, :, None, None]
    y = jnp.maximum(y, 0.0)
    N, Cout, H, W = y.shape
    r = down_factor
    C = Cout // (r * r)
    y = y.reshape(N, C, r, r, H, W)
    y = jnp.transpose(y, (0, 1, 4, 2, 5, 3))
    return y.reshape(N, C, H * r, W * r)


if __name__ == "__main__":
    # Module config: down_factor=2, in_dim=4, num_classes=4 -> upsample_dim=16
    down_factor = 2
    in_dim = 4
    num_classes = 4
    upsample_dim = down_factor ** 2 * num_classes

    N, H, W = 2, 16, 16

    key = jax.random.PRNGKey(0)
    kx, kw, kb, kg, kbe, km, kv = jax.random.split(key, 7)

    x = jax.random.normal(kx, (N, in_dim, H, W), dtype=jnp.float32)

    # Deterministic synthetic parameters (shapes per nn.Conv2d / nn.BatchNorm2d).
    conv_w = 0.1 * jax.random.normal(kw, (upsample_dim, in_dim, 3, 3),
                                     dtype=jnp.float32)
    conv_b = 0.05 * jax.random.normal(kb, (upsample_dim,), dtype=jnp.float32)
    gamma = 1.0 + 0.1 * jax.random.normal(kg, (upsample_dim,), dtype=jnp.float32)
    beta = 0.1 * jax.random.normal(kbe, (upsample_dim,), dtype=jnp.float32)
    running_mean = 0.1 * jax.random.normal(km, (upsample_dim,), dtype=jnp.float32)
    running_var = 1.0 + 0.1 * jax.nn.sigmoid(
        jax.random.normal(kv, (upsample_dim,), dtype=jnp.float32))

    # One-time, host-side parameter prep (band matrices, BN fold, column perm).
    t, bias_cols = make_duc_params(conv_w, conv_b, gamma, beta, running_mean,
                                   running_var, width=W, down_factor=down_factor)

    fwd = jax.jit(functools.partial(duc_forward, down_factor=down_factor))
    out = fwd(x, t, bias_cols)
    out = jax.block_until_ready(out)

    assert out.shape == (N, num_classes, H * down_factor, W * down_factor), out.shape

    ref = _reference(x, conv_w, conv_b, gamma, beta, running_mean, running_var,
                     down_factor=down_factor)
    # bf16 inputs / weights (BN scale folded) / output, f32 accumulation & bias
    # -> loosened tolerance vs f32 reference.
    assert jnp.allclose(out, ref, atol=3e-2, rtol=3e-2), float(
        jnp.max(jnp.abs(out - ref)))

    print("KERNEL_OK")
</pallas_src>

<mosaic_0001>
module attributes {stable_mosaic.version = 11 : i64} {
  func.func @_duc_kernel(%arg0: i32, %arg1: memref<32x192xbf16, #tpu.memory_space<vmem>>, %arg2: memref<192x256xbf16, #tpu.memory_space<vmem>>, %arg3: memref<1x256xf32, #tpu.memory_space<vmem>>, %arg4: memref<32x256xbf16, #tpu.memory_space<vmem>>) attributes {dimension_semantics = [#tpu.dimension_semantics<arbitrary>], iteration_bounds = array<i64: 1>, scalar_prefetch = 0 : i64, scratch_operands = 0 : i64, tpu.core_type = #tpu.core_type<tc>, window_params = [{pipeline_mode = #tpu.pipeline_mode<synchronous>, transform_indices = @transform_0, window_bounds = array<i64: 32, 192>}, {pipeline_mode = #tpu.pipeline_mode<synchronous>, transform_indices = @transform_1, window_bounds = array<i64: 192, 256>}, {pipeline_mode = #tpu.pipeline_mode<synchronous>, transform_indices = @transform_2, window_bounds = array<i64: 1, 256>}, {pipeline_mode = #tpu.pipeline_mode<synchronous>, transform_indices = @transform_3, window_bounds = array<i64: 32, 256>}]} {
    %c0 = arith.constant 0 : index
    %c0_0 = arith.constant 0 : index
    %0 = vector.load %arg1[%c0, %c0_0] : memref<32x192xbf16, #tpu.memory_space<vmem>>, vector<32x192xbf16>
    %c0_1 = arith.constant 0 : index
    %c0_2 = arith.constant 0 : index
    %1 = vector.load %arg2[%c0_1, %c0_2] : memref<192x256xbf16, #tpu.memory_space<vmem>>, vector<192x256xbf16>
    %cst = arith.constant dense<0.000000e+00> : vector<32x256xf32>
    %2 = tpu.matmul %0, %1, %cst {dimension_numbers = #tpu.dot_dimension_numbers<[1], [0], [0], [1], [0, 0, 1, 1], [], []>} : vector<32x192xbf16>, vector<192x256xbf16>, vector<32x256xf32> -> vector<32x256xf32>
    %c0_3 = arith.constant 0 : index
    %c0_4 = arith.constant 0 : index
    %3 = vector.load %arg3[%c0_3, %c0_4] : memref<1x256xf32, #tpu.memory_space<vmem>>, vector<1x256xf32>
    %4 = vector.broadcast %3 : vector<1x256xf32> to vector<32x256xf32>
    %5 = arith.addf %2, %4 : vector<32x256xf32>
    %cst_5 = arith.constant 0.000000e+00 : f32
    %6 = vector.broadcast %cst_5 : f32 to vector<32x256xf32>
    %7 = arith.maximumf %5, %6 : vector<32x256xf32>
    %8 = arith.truncf %7 : vector<32x256xf32> to vector<32x256xbf16>
    %c0_6 = arith.constant 0 : index
    %c0_7 = arith.constant 0 : index
    %9 = vector.load %arg4[%c0_6, %c0_7] : memref<32x256xbf16, #tpu.memory_space<vmem>>, vector<32x256xbf16>
    tpu.vector_store %arg4[%c0_6, %c0_7], %8 {strides = array<i32>} : memref<32x256xbf16, #tpu.memory_space<vmem>>, vector<32x256xbf16>,
    return
  }
  func.func @transform_0(%arg0: i32) -> (i32, i32) {
    %c0_i32 = arith.constant 0 : i32
    %c0_i32_0 = arith.constant 0 : i32
    %c0_i32_1 = arith.constant 0 : i32
    return %c0_i32, %c0_i32_0 : i32, i32
  }
  func.func @transform_1(%arg0: i32) -> (i32, i32) {
    %c0_i32 = arith.constant 0 : i32
    %c0_i32_0 = arith.constant 0 : i32
    %c0_i32_1 = arith.constant 0 : i32
    return %c0_i32, %c0_i32_0 : i32, i32
  }
  func.func @transform_2(%arg0: i32) -> (i32, i32) {
    %c0_i32 = arith.constant 0 : i32
    %c0_i32_0 = arith.constant 0 : i32
    %c0_i32_1 = arith.constant 0 : i32
    return %c0_i32, %c0_i32_0 : i32, i32
  }
  func.func @transform_3(%arg0: i32) -> (i32, i32) {
    %c0_i32 = arith.constant 0 : i32
    %c0_i32_0 = arith.constant 0 : i32
    %c0_i32_1 = arith.constant 0 : i32
    return %c0_i32, %c0_i32_0 : i32, i32
  }
}

</mosaic_0001>

<bundles_post_ra>
// kernel: duc_forward.1
= control target key start
LH: loop header
LB: loop body
LE: loop exit
PB: predicated region body
PF: predicated region fallthrough
CT: control target
= control target key end

     0   :  { %vm193_vm0 = vcmask 523264   ;;  %v45_v28 = vlaneseq  ;;  %s516_s1 = inlined_call_operand.vmem [shape: bf16[192,256], index: 1, kind: input, shape index: {}]   ;;  %s517_s0 = inlined_call_operand.vmem [shape: bf16[32,192], index: 0, kind: input, shape index: {}]   ;;  %s518_s2 = inlined_call_operand.vmem [shape: f32[1,256], index: 2, kind: input, shape index: {}]   ;;  %s519_s3 = inlined_call_operand.vmem [shape: bf16[32,256], index: 3, kind: output, shape index: {}]  }
   0x1   :  { %v355_v0 = vld [vmem:[%s516_s1 + $0x74] ss:$8 sps:$4 sm:$0xff]   ;;  %v357_v1 = vld [vmem:[%s516_s1 + $0x70] ss:$8 sps:$4 sm:$0xff]   ;;  %v358_v2 = vld [vmem:[%s516_s1 + $0x64] ss:$8 sps:$4 sm:$0xff]  }
   0x2   :  { %200 = vmatprep.subr.bf16.mxu0 %v355_v0  ;;  %331 = vmatprep.subr.bf16.mxu1 %v355_v0  ;;  %v360_v3 = vld [vmem:[%s516_s1 + $0x60] ss:$8 sps:$4 sm:$0xff]   ;;  %v361_v4 = vld [vmem:[%s516_s1 + $0x54] ss:$8 sps:$4 sm:$0xff]   ;;  %v363_v5 = vld [vmem:[%s516_s1 + $0x50] ss:$8 sps:$4 sm:$0xff]  }
   0x3   :  { %201 = vmatpush1.bf16.msra.mxu0 %v357_v1  ;;  %343 = vmatpush1.bf16.msra.mxu1 %v357_v1  ;;  %v364_v6 = vld [vmem:[%s516_s1 + $0x44] ss:$8 sps:$4 sm:$0xff]   ;;  %v366_v7 = vld [vmem:[%s516_s1 + $0x40] ss:$8 sps:$4 sm:$0xff]   ;;  %v367_v8 = vld [vmem:[%s516_s1 + $0x34] ss:$8 sps:$4 sm:$0xff]  }
   0x4   :  { %202 = vmatprep.subr.bf16.mxu0 %v358_v2  ;;  %332 = vmatprep.subr.bf16.mxu1 %v358_v2  ;;  %v369_v9 = vld [vmem:[%s516_s1 + $0x30] ss:$8 sps:$4 sm:$0xff]   ;;  %v370_v10 = vld [vmem:[%s516_s1 + $0x24] ss:$8 sps:$4 sm:$0xff]   ;;  %v396_v12 = vld [vmem:[%s517_s0 + $0x14] ss:$8 sps:$4 sm:$0xff]  }
   0x5   :  { %v393_v11 = vld [vmem:[%s517_s0 + $0x4] ss:$8 sps:$4 sm:$0xff]   ;;  %v372_v13 = vld [vmem:[%s516_s1 + $0x20] ss:$8 sps:$4 sm:$0xff]   ;;  %v373_v14 = vld [vmem:[%s516_s1 + $0x14] ss:$8 sps:$4 sm:$0xff]   ;;  %322 = vmatprep.mubr.msk.bf16.mxu1 %vm193_vm0, %v396_v12 }
   0x6   :  { %321 = vmatprep.mubr.msk.bf16.mxu0 %vm193_vm0, %v393_v11  ;;  %v375_v15 = vld [vmem:[%s516_s1 + $0x10] ss:$8 sps:$4 sm:$0xff]   ;;  %v376_v16 = vld [vmem:[%s516_s1 + $0x4] ss:$8 sps:$4 sm:$0xff]   ;;  %v378_v17 = vld [vmem:[%s516_s1] ss:$8 sps:$4 sm:$0xff]  }
   0x7   :  { %203 = vmatpush1.bf16.msra.mxu0 %v360_v3  ;;  %344 = vmatpush1.bf16.msra.mxu1 %v360_v3  ;;  %v379_v18 = vld [vmem:[%s516_s1 + $0xb4] ss:$8 sps:$4 sm:$0xff]   ;;  %v381_v19 = vld [vmem:[%s516_s1 + $0xb0] ss:$8 sps:$4 sm:$0xff]   ;;  %v382_v20 = vld [vmem:[%s516_s1 + $0xa4] ss:$8 sps:$4 sm:$0xff]  }
   0x8   :  { %204 = vmatprep.subr.bf16.mxu0 %v361_v4  ;;  %333 = vmatprep.subr.bf16.mxu1 %v361_v4  ;;  %v384_v21 = vld [vmem:[%s516_s1 + $0xa0] ss:$8 sps:$4 sm:$0xff]   ;;  %v385_v22 = vld [vmem:[%s516_s1 + $0x94] ss:$8 sps:$4 sm:$0xff]   ;;  %v387_v23 = vld [vmem:[%s516_s1 + $0x90] ss:$8 sps:$4 sm:$0xff]  }
   0x9   :  { %v388_v24 = vld [vmem:[%s516_s1 + $0x84] ss:$8 sps:$4 sm:$0xff]   ;;  %v390_v25 = vld [vmem:[%s516_s1 + $0x80] ss:$8 sps:$4 sm:$0xff]   ;;  %v394_v27 = vld [vmem:[%s517_s0 + $0x10] ss:$8 sps:$4 sm:$0xff]  }
   0xa   :  { %v391_v26 = vld [vmem:[%s517_s0] ss:$8 sps:$4 sm:$0xff]   ;;  %v46_v29 = vshrl.u32 %v45_v28, 7 }
   0xb   :  { %205 = vmatpush1.bf16.msra.mxu0 %v363_v5  ;;  %345 = vmatpush1.bf16.msra.mxu1 %v363_v5  ;;  %v43_v31 = vld [vmem:[%s518_s2] sm:$0x3] }
   0xc   :  { %206 = vmatprep.subr.bf16.mxu0 %v364_v6  ;;  %334 = vmatprep.subr.bf16.mxu1 %v364_v6  ;;  %v47_v30 = vsub.s32 0, %v46_v29  ;;  %v51_v32 = vsub.s32 1, %v46_v29 }
   0xe   :  { %v48_v33 = vrot.slane %v43_v31, %v47_v30  ;;  %v52_v34 = vrot.slane %v43_v31, %v51_v32 }
   0xf   :  { %207 = vmatpush1.bf16.msra.mxu0 %v366_v7  ;;  %346 = vmatpush1.bf16.msra.mxu1 %v366_v7 }
  0x10   :  { %208 = vmatprep.subr.bf16.mxu0 %v367_v8  ;;  %335 = vmatprep.subr.bf16.mxu1 %v367_v8 }
  0x13   :  { %209 = vmatpush1.bf16.msra.mxu0 %v369_v9  ;;  %347 = vmatpush1.bf16.msra.mxu1 %v369_v9 }
  0x14   :  { %210 = vmatprep.subr.bf16.mxu0 %v370_v10  ;;  %336 = vmatprep.subr.bf16.mxu1 %v370_v10 }
  0x17   :  { %211 = vmatpush1.bf16.msra.mxu0 %v372_v13  ;;  %348 = vmatpush1.bf16.msra.mxu1 %v372_v13 }
  0x18   :  { %212 = vmatprep.subr.bf16.mxu0 %v373_v14  ;;  %337 = vmatprep.subr.bf16.mxu1 %v373_v14 }
  0x1b   :  { %213 = vmatpush1.bf16.msra.mxu0 %v375_v15  ;;  %349 = vmatpush1.bf16.msra.mxu1 %v375_v15 }
  0x1c   :  { %214 = vmatprep.subr.bf16.mxu0 %v376_v16  ;;  %338 = vmatprep.subr.bf16.mxu1 %v376_v16 }
  0x1f   :  { %215 = vmatpush1.bf16.msra.mxu0 %v378_v17  ;;  %350 = vmatpush1.bf16.msra.mxu1 %v378_v17 }
  0x20   :  { %224 = vmatprep.subr.bf16.mxu0 %v379_v18  ;;  %339 = vmatprep.subr.bf16.mxu1 %v379_v18 }
  0x23   :  { %225 = vmatpush2.bf16.msra.mxu0 %v381_v19  ;;  %351 = vmatpush2.bf16.msra.mxu1 %v381_v19 }
  0x24   :  { %226 = vmatprep.subr.bf16.mxu0 %v382_v20  ;;  %340 = vmatprep.subr.bf16.mxu1 %v382_v20 }
  0x27   :  { %227 = vmatpush2.bf16.msra.mxu0 %v384_v21  ;;  %352 = vmatpush2.bf16.msra.mxu1 %v384_v21 }
  0x28   :  { %228 = vmatprep.subr.bf16.mxu0 %v385_v22  ;;  %341 = vmatprep.subr.bf16.mxu1 %v385_v22 }
  0x2b   :  { %229 = vmatpush2.bf16.msra.mxu0 %v387_v23  ;;  %353 = vmatpush2.bf16.msra.mxu1 %v387_v23 }
  0x2c   :  { %230 = vmatprep.subr.bf16.mxu0 %v388_v24  ;;  %342 = vmatprep.subr.bf16.mxu1 %v388_v24 }
  0x2f   :  { %231 = vmatpush2.bf16.msra.mxu0 %v390_v25  ;;  %354 = vmatpush2.bf16.msra.mxu1 %v390_v25 }
  0x32   :  { %233 = vmatmul.mubr.bf16.vlgmr.msra.gmra.mxu0 %v391_v26  ;;  %243 = vmatmul.mubr.bf16.vlgmr.msra.gmra.mxu1 %v394_v27 }
  0xf2   :  { %v234_v35 = vpop.f32.mrf.mxu0  ;;  %v244_v36 = vpop.f32.mrf.mxu1 }
  0xf3   :  { %v235_v37 = vadd.f32 %v234_v35, %v48_v33  ;;  %v245_v38 = vadd.f32 %v244_v36, %v48_v33 }
  0xf4   :  { %v236_v39 = vpop.f32.mrf.mxu0  ;;  %v246_v40 = vpop.f32.mrf.mxu1 }
  0xf5   :  { %v237_v41 = vadd.f32 %v236_v39, %v52_v34  ;;  %v247_v42 = vadd.f32 %v246_v40, %v52_v34  ;;  %v253_v45 = vmax.f32 %v235_v37, 0.0  ;;  %v257_v46 = vmax.f32 %v245_v38, 0.0 }
  0xf6   :  { %v238_v43 = vpop.f32.mrf.mxu0  ;;  %v248_v44 = vpop.f32.mrf.mxu1 }
  0xf7   :  { %v254_v47 = vmax.f32 %v237_v41, 0.0  ;;  %v258_v48 = vmax.f32 %v247_v42, 0.0  ;;  %v239_v49 = vadd.f32 %v238_v43, %v48_v33  ;;  %v249_v50 = vadd.f32 %v248_v44, %v48_v33 }
  0xf8   :  { %v240_v51 = vpop.f32.mrf.mxu0  ;;  %v250_v52 = vpop.f32.mrf.mxu1 }
  0xf9   :  { %v327_v53 = vpack.c.bf16 %v254_v47, %v253_v45  ;;  %v329_v54 = vpack.c.bf16 %v258_v48, %v257_v46  ;;  %v241_v55 = vadd.f32 %v240_v51, %v52_v34  ;;  %v251_v56 = vadd.f32 %v250_v52, %v52_v34 }
  0xfa   :  { %v255_v57 = vmax.f32 %v239_v49, 0.0  ;;  %v259_v58 = vmax.f32 %v249_v50, 0.0 }
  0xfb   :  { %285 = vst [vmem:[%s519_s3] sm:$0xff] %v327_v53  ;;  %287 = vst [vmem:[%s519_s3 + $0x10] sm:$0xff] %v329_v54  ;;  %v256_v59 = vmax.f32 %v241_v55, 0.0  ;;  %v260_v60 = vmax.f32 %v251_v56, 0.0 }
  0xfd   :  { %v328_v61 = vpack.c.bf16 %v256_v59, %v255_v57  ;;  %v330_v62 = vpack.c.bf16 %v260_v60, %v259_v58 }
  0xff   :  { %286 = vst [vmem:[%s519_s3 + $0x8] sm:$0xff] %v328_v61  ;;  %288 = vst [vmem:[%s519_s3 + $0x18] sm:$0xff] %v330_v62 }

</bundles_post_ra>
